<compile_context>
chip_gen: v7x
topology: tpu7x:2x2x1
jax: 0.10.0
libtpu: 0.0.40
codegen_flags: <defaults>
</compile_context>

<pallas_src>
import math

import jax
import jax.numpy as jnp
from jax.experimental import pallas as pl
from jax.experimental.pallas import tpu as pltpu

_MIB = 1024 * 1024


def _ace_linear_kernel(x_ref, w_ref, b_ref, o_ref):
    """One row-tile of F.linear(x, weight, bias) with a (1, D) weight.

    x_ref: (tm, D) VMEM (storage dtype)   w_ref: (1, D) VMEM
    b_ref: (1,)    SMEM (f32)             o_ref: (1, 1, tm) VMEM (lane-dense row)
    """
    x = x_ref[...].astype(jnp.float32)          # cast in-kernel; HBM moves storage dtype
    w = w_ref[...].astype(jnp.float32)          # (1, D), broadcasts over rows
    b = b_ref[0]                                # scalar bias
    # VPU elementwise multiply + XLU lane-reduce over D; MXU stays idle.
    r = jnp.sum(x * w, axis=-1) + b             # (tm,)
    # Lane-dense store: one wide row per grid step instead of a (tm, 1) column.
    o_ref[...] = r[None, None, :].astype(o_ref.dtype)


def _tpu_generation_params():
    """Returns (step_target_bytes, vmem_budget_bytes, vmem_limit_bytes, two_tensorcores)."""
    try:
        vmem_cap = int(pltpu.get_tpu_info().vmem_capacity_bytes)
    except Exception:
        vmem_cap = 64 * _MIB                     # conservative fallback: v7x-class part
    if vmem_cap <= 64 * _MIB:
        # v7x: 64 MiB VMEM, ~3.2 TB/s HBM, 2 TensorCores/chip -> bigger steps, >=2-step grid.
        return 8 * _MIB, 24 * _MIB, 32 * _MIB, True
    # v5e / v6e: 128 MiB VMEM, single TensorCore -> larger VMEM headroom, 4 MiB steps.
    return 4 * _MIB, 48 * _MIB, 64 * _MIB, False


def _choose_row_tile(n, d, itemsize, step_target_bytes, vmem_budget_bytes, two_tc):
    """Row tile sized by bytes/step, capped by VMEM budget and (on v7x) a >=2-step grid."""
    bytes_per_row = max(1, d * itemsize)
    tm = max(8, step_target_bytes // bytes_per_row)                 # bytes-per-step target
    # ~3x the tile lives in VMEM: double-buffered input + elementwise temp.
    tm = min(tm, max(8, vmem_budget_bytes // (3 * bytes_per_row)))
    # Keep the (tm,) -> (1,1,tm) relayout well off any XLU critical path.
    tm = min(tm, 16384)
    n_pad8 = ((n + 7) // 8) * 8
    tm = min(tm, n_pad8)
    if two_tc and n_pad8 >= 256:
        # Ensure >= 2 grid steps so the "parallel" axis shards across both TCs.
        half = (pl.cdiv(n_pad8, 2) // 128) * 128
        if half >= 128:
            tm = min(tm, half)
    if tm >= 128:
        tm = (tm // 128) * 128                  # lane-width multiple for the output row
    else:
        tm = max(8, (tm // 8) * 8)              # at least one sublane group
    return int(tm)


def ace_regression_forward(x, weight, bias, *, tm=None):
    """Pallas TPU implementation of AceRegression.forward.

    x:      (N, D) float (any storage dtype; cast to f32 inside the kernel)
    weight: (1, D) float32
    bias:   (1,)   float32
    returns (N, 1)
    """
    N, D = x.shape
    weight = jnp.asarray(weight).reshape(1, D)
    bias = jnp.asarray(bias, dtype=jnp.float32).reshape(1)
    out_dtype = jnp.promote_types(x.dtype, weight.dtype)

    step_target, vmem_budget, vmem_limit, two_tc = _tpu_generation_params()
    if tm is None:
        tm = _choose_row_tile(N, D, jnp.dtype(x.dtype).itemsize,
                              step_target, vmem_budget, two_tc)

    grid_rows = pl.cdiv(N, tm)          # ragged last block instead of a jnp.pad copy
    n_out = grid_rows * tm

    out = pl.pallas_call(
        _ace_linear_kernel,
        out_shape=jax.ShapeDtypeStruct((grid_rows, 1, tm), out_dtype),
        grid_spec=pltpu.PrefetchScalarGridSpec(
            num_scalar_prefetch=0,
            grid=(grid_rows,),
            in_specs=[
                pl.BlockSpec((tm, D), lambda i: (i, 0)),             # streamed X row-tile
                pl.BlockSpec((1, D), lambda i: (0, 0)),              # weight (VMEM-resident)
                pl.BlockSpec(memory_space=pltpu.MemorySpace.SMEM),   # bias scalar
            ],
            out_specs=pl.BlockSpec((1, 1, tm), lambda i: (i, 0, 0)),  # lane-dense row
        ),
        compiler_params=pltpu.CompilerParams(
            dimension_semantics=("parallel",),          # megacore / v7x 2-TC sharding
            vmem_limit_bytes=vmem_limit,
        ),
        cost_estimate=pl.CostEstimate(
            flops=2 * N * D,
            bytes_accessed=(N * D * jnp.dtype(x.dtype).itemsize
                            + D * jnp.dtype(weight.dtype).itemsize
                            + int(bias.dtype.itemsize)
                            + n_out * jnp.dtype(out_dtype).itemsize),
            transcendentals=0,
        ),
    )(x, weight, bias)

    # (G, 1, tm) lane-dense rows -> (N, 1) column.  Rows >= N come from the
    # ragged tail block (garbage / possible NaN) and are sliced away here;
    # they are never reduced over or inspected.
    return out.reshape(n_out, 1)[:N]


def init_ace_params(key, input_dim):
    """uniform(-stdv, stdv) with stdv = 1/sqrt(input_dim), matching reset_parameters."""
    stdv = 1.0 / math.sqrt(input_dim)
    k_w, k_b = jax.random.split(key)
    weight = jax.random.uniform(
        k_w, (1, input_dim), dtype=jnp.float32, minval=-stdv, maxval=stdv)
    bias = jax.random.uniform(
        k_b, (1,), dtype=jnp.float32, minval=-stdv, maxval=stdv)
    return weight, bias


if __name__ == "__main__":
    key = jax.random.PRNGKey(0)
    k_x, k_p = jax.random.split(key)

    # 1) Small shapes consistent with the module (auto tile).
    N, input_dim = 8, 32
    x = jax.random.normal(k_x, (N, input_dim), dtype=jnp.float32)
    weight, bias = init_ace_params(k_p, input_dim)
    out = jax.block_until_ready(ace_regression_forward(x, weight, bias))
    ref = x @ weight.T + bias[None, :]
    assert out.shape == (N, 1)
    assert jnp.allclose(out, ref, atol=1e-5, rtol=1e-5)

    # 2) Non-multiple-of-tile N: exercises the ragged last block (no pad copy)
    #    and a multi-step grid.
    N2, D2 = 300, 256
    k_x2, k_p2 = jax.random.split(k_p)
    x2 = jax.random.normal(k_x2, (N2, D2), dtype=jnp.float32)
    w2, b2 = init_ace_params(k_p2, D2)
    out2 = jax.block_until_ready(ace_regression_forward(x2, w2, b2, tm=128))
    ref2 = x2 @ w2.T + b2[None, :]
    assert out2.shape == (N2, 1)
    assert jnp.allclose(out2, ref2, atol=1e-4, rtol=1e-4)

    # 3) bf16 storage dtype streams at half the HBM bytes (cast happens in-kernel).
    x3 = x2.astype(jnp.bfloat16)
    out3 = jax.block_until_ready(ace_regression_forward(x3, w2, b2, tm=128))
    ref3 = x3.astype(jnp.float32) @ w2.T + b2[None, :]
    assert out3.shape == (N2, 1)
    assert jnp.allclose(out3, ref3, atol=1e-4, rtol=1e-4)

    print("KERNEL_OK")
</pallas_src>

<mosaic_0001>
module attributes {stable_mosaic.version = 11 : i64} {
  func.func @_ace_linear_kernel(%arg0: i32, %arg1: memref<8x32xf32, #tpu.memory_space<vmem>>, %arg2: memref<1x32xf32, #tpu.memory_space<vmem>>, %arg3: memref<1xf32, #tpu.memory_space<smem>>, %arg4: memref<1x1x8xf32, #tpu.memory_space<vmem>>) attributes {dimension_semantics = [#tpu.dimension_semantics<parallel>], iteration_bounds = array<i64: 1>, scalar_prefetch = 0 : i64, scratch_operands = 0 : i64, tpu.core_type = #tpu.core_type<tc>, window_params = [{transform_indices = @transform_0, window_bounds = array<i64: 8, 32>}, {pipeline_mode = #tpu.pipeline_mode<synchronous>, transform_indices = @transform_1, window_bounds = array<i64: 1, 32>}, {transform_indices = @transform_2, window_bounds = array<i64: 1>}, {transform_indices = @transform_3, window_bounds = array<i64: 1, 1, 8>}]} {
    %c0 = arith.constant 0 : index
    %c0_0 = arith.constant 0 : index
    %0 = vector.load %arg1[%c0, %c0_0] : memref<8x32xf32, #tpu.memory_space<vmem>>, vector<8x32xf32>
    %c0_1 = arith.constant 0 : index
    %c0_2 = arith.constant 0 : index
    %1 = vector.load %arg2[%c0_1, %c0_2] : memref<1x32xf32, #tpu.memory_space<vmem>>, vector<1x32xf32>
    %c0_3 = arith.constant 0 : index
    %2 = memref.load %arg3[%c0_3] : memref<1xf32, #tpu.memory_space<smem>>
    %3 = vector.broadcast %1 : vector<1x32xf32> to vector<8x32xf32>
    %4 = arith.mulf %0, %3 : vector<8x32xf32>
    %cst = arith.constant dense<0.000000e+00> : vector<8xf32>
    %5 = vector.multi_reduction <add>, %4, %cst [1] : vector<8x32xf32> to vector<8xf32>
    %6 = vector.broadcast %2 : f32 to vector<8xf32>
    %7 = arith.addf %5, %6 : vector<8xf32>
    %8 = vector.shape_cast %7 : vector<8xf32> to vector<1x1x8xf32>
    %c0_4 = arith.constant 0 : index
    %c0_5 = arith.constant 0 : index
    %c0_6 = arith.constant 0 : index
    %9 = vector.load %arg4[%c0_4, %c0_5, %c0_6] : memref<1x1x8xf32, #tpu.memory_space<vmem>>, vector<1x1x8xf32>
    tpu.vector_store %arg4[%c0_4, %c0_5, %c0_6], %8 {strides = array<i32>} : memref<1x1x8xf32, #tpu.memory_space<vmem>>, vector<1x1x8xf32>,
    return
  }
  func.func @transform_0(%arg0: i32) -> (i32, i32) {
    %c0_i32 = arith.constant 0 : i32
    %c0_i32_0 = arith.constant 0 : i32
    return %arg0, %c0_i32 : i32, i32
  }
  func.func @transform_1(%arg0: i32) -> (i32, i32) {
    %c0_i32 = arith.constant 0 : i32
    %c0_i32_0 = arith.constant 0 : i32
    %c0_i32_1 = arith.constant 0 : i32
    return %c0_i32, %c0_i32_0 : i32, i32
  }
  func.func @transform_2(%arg0: i32) -> i32 {
    %c0_i32 = arith.constant 0 : i32
    %c0_i32_0 = arith.constant 0 : i32
    return %c0_i32 : i32
  }
  func.func @transform_3(%arg0: i32) -> (i32, i32, i32) {
    %c0_i32 = arith.constant 0 : i32
    %c0_i32_0 = arith.constant 0 : i32
    %c0_i32_1 = arith.constant 0 : i32
    return %arg0, %c0_i32, %c0_i32_0 : i32, i32, i32
  }
}

</mosaic_0001>

<bundles_post_ra>
// kernel: tpu_custom_call.1
= control target key start
LH: loop header
LB: loop body
LE: loop exit
PB: predicated region body
PF: predicated region fallthrough
CT: control target
= control target key end

     0   :  { %9 = vsyncpa [#allocation4], 0  ;;  %s172_s0 = inlined_call_operand.hbm [shape: f32[8,32], index: 0, kind: input, shape index: {}]   ;;  %s173_s1 = inlined_call_operand.vmem [shape: f32[1,32], index: 1, kind: input, shape index: {}]   ;;  %s174_s2 = inlined_call_operand.<no memory space> [shape: f32[1], index: 2, kind: input, shape index: {}]   ;;  %s175_s3 = inlined_call_operand.hbm [shape: f32[1,1,8], index: 3, kind: output, shape index: {}]  }
   0x1   :  { %10 = vsyncpa [#allocation5], 0  ;;  %s120_s12 = smov [#allocation3]   ;;  %s72_s16 = scalar_lea.hbm %s172_s0, 128 }
   0x2   :  { %s17_s13 = sshll.u32 %s120_s12, 4  ;;  %p73_p0 = scmp.ne.s32.totalorder %s172_s0, %s72_s16  ;;  %s18_s13 = int_to_ptr.vmem [resolvable:$true] %s17_s13 }
   0x3   :  { %p76_p1 = scmp.lt.u32.totalorder %s72_s16, %s172_s0 }
   0x5   :  { %p78_p2 = pnand %p76_p1, %p73_p0 }
   0x7   :  { %81 = shalt.err (!%p78_p2)
}
   0x8   :  { %s82_s21 = scalar_lea.vmem %s18_s13, 128  ;;  %p87_p4 = scmp.lt.s32.totalorder %s18_s13, %s18_s13 }
   0x9   :  { %p83_p3 = scmp.ne.s32.totalorder %s18_s13, %s82_s21  ;;  %p88_p5 = scmp.lt.s32.totalorder %s82_s21, %s82_s21 }
   0xb   :  { %p89_p6 = por %p88_p5, %p87_p4 }
   0xd   :  { %p90_p7 = pnand %p89_p6, %p83_p3 }
   0xf   :  { %93 = shalt.err (!%p90_p7)
}
  0x10   :  { %20 = dma.hbm_to_vmem [thread:$0]  %s172_s0, 128, %s18_s13, [#allocation4]  }
  0x11   :  { %116 = dma.done.wait [#allocation4], 128  }
  0x12   :  { %117 = vsyncadd [#allocation4], 4294967168  ;;  %v28_v0 = vld [vmem:[#allocation3] sm:$0xff]  ;;  %vm38_vm0 = vcmask 261120   ;;  %v45_v4 = vlaneseq  ;;  %v42_v7 = vstv %s174_s2  ;;  %s121_s0 = smov [#allocation6]   ;;  %vm52_vm1 = vcmask 57344  }
  0x13   :  { %v69_v1 = vld [vmem:[%s173_s1] ss:$0 sm:$0xff]  ;;  %s60_s28 = sshll.u32 %s121_s0, 4  ;;  %s61_s28 = int_to_ptr.vmem [resolvable:$true] %s60_s28 }
  0x14   :  { %v37_v2 = vmul.f32 %v69_v1, %v28_v0  ;;  %v46_v5 = vand.u32 127, %v45_v4  ;;  %v48_v6 = vshrl.u32 %v45_v4, 7  ;;  %s94_s1 = scalar_lea.vmem %s61_s28, 16  ;;  %s98_s29 = scalar_lea.vmem %s61_s28, 32 }
  0x15   :  { %p95_p8 = scmp.ne.s32.totalorder %s61_s28, %s94_s1  ;;  %p99_p9 = scmp.lt.s32.totalorder %s61_s28, %s61_s28 }
  0x16   :  { %v39_v3 = vsel %vm38_vm0, %v37_v2, 0.0  ;;  %v49_v8 = vsub.s32 %v46_v5, %v48_v6  ;;  %p100_p10 = scmp.lt.s32.totalorder %s98_s29, %s94_s1 }
  0x17   :  { %40 = vadd.xlane.f32.xlu0 %v39_v3 }
  0x18   :  { %p101_p11 = por %p100_p10, %p99_p9 }
  0x1a   :  { %p102_p12 = pnand %p101_p11, %p95_p8 }
  0xa4   :  { %v41_v9 = vpop.xlane.xlu0 %40 }
  0xa5   :  { %v43_v10 = vadd.f32 %v42_v7, %v41_v9 }
  0xa7   :  { %v50_v11 = vrot.slane %v43_v10, %v49_v8 }
  0xa9   :  { %53 = vst.msk [vmem:[#allocation6] sm:$0x1] %vm52_vm1, %v50_v11 }
  0xaa   :  { %105 = shalt.err (!%p102_p12)
}
  0xab   :  { %s106_s2 = scalar_lea.hbm %s175_s3, 16 }
  0xac   :  { %p107_p13 = scmp.ne.s32.totalorder %s175_s3, %s106_s2  ;;  %p110_p0 = scmp.lt.u32.totalorder %s106_s2, %s175_s3 }
  0xae   :  { %p112_p1 = pnand %p110_p0, %p107_p13 }
  0xb0   :  { %115 = shalt.err (!%p112_p1)
}
  0xb1   :  { %63 = dma.vmem_to_hbm [thread:$0]  %s61_s28, 16, %s175_s3, [#allocation5]  }
  0xb2   :  { %118 = dma.done.wait [#allocation5], 16  }
  0xb3   :  { %119 = vsyncadd [#allocation5], 4294967280 }
  0xb4   :  { %67 = vsyncpa [#allocation4], 1 }
  0xb5   :  { %68 = vsyncpa [#allocation5], 1 }

</bundles_post_ra>
